<compile_context>
chip_gen: v7x
topology: tpu7x:2x2x1
jax: 0.10.0
libtpu: 0.0.40
codegen_flags: <defaults>
</compile_context>

<pallas_src>
import functools

import jax
import jax.numpy as jnp
from jax.experimental import pallas as pl
from jax.experimental.pallas import tpu as pltpu

_VMEM_LIMIT = 32 * 1024 * 1024  # safe scoped-VMEM cap on v5e/v6e/v7x
_BN_EPS = 1e-5


# ----------------------------------------------------------------------------
# Kernels
# ----------------------------------------------------------------------------
def _conv_bn_act_kernel(x_ref, w_ref, b_ref, o_ref, *, apply_relu):
    # x_ref: (1, C_in, tile_P), w_ref: (1, C_out, C_in), b_ref: (C_out, 1) f32
    x = x_ref[0]
    w = w_ref[0]
    y = jnp.dot(w, x, preferred_element_type=jnp.float32) + b_ref[...]
    if apply_relu:
        y = jnp.maximum(y, 0.0)
    o_ref[0] = y.astype(o_ref.dtype)


def _conv_bn_act_max_kernel(x_ref, w_ref, b_ref, o_ref, *, apply_relu):
    # Same as above but fused with max over the point axis; the output block
    # (1, C_out, 1) is revisited across the tile axis (running max).
    j = pl.program_id(1)
    x = x_ref[0]
    w = w_ref[0]
    y = jnp.dot(w, x, preferred_element_type=jnp.float32) + b_ref[...]
    if apply_relu:
        y = jnp.maximum(y, 0.0)
    m = jnp.max(y, axis=-1, keepdims=True)  # (C_out, 1)

    @pl.when(j == 0)
    def _():
        o_ref[0] = m.astype(o_ref.dtype)

    @pl.when(j > 0)
    def _():
        o_ref[0] = jnp.maximum(o_ref[0], m.astype(o_ref.dtype))


def _linear_act_kernel(x_ref, wt_ref, b_ref, o_ref, *, apply_relu):
    # x_ref: (B, C_in), wt_ref: (C_in, C_out), b_ref: (1, C_out)
    y = jnp.dot(x_ref[...], wt_ref[...],
                preferred_element_type=jnp.float32) + b_ref[...]
    if apply_relu:
        y = jnp.maximum(y, 0.0)
    o_ref[...] = y.astype(o_ref.dtype)


# ----------------------------------------------------------------------------
# Wrappers
# ----------------------------------------------------------------------------
def _choose_tile(p, cap=1024):
    """Largest multiple of 128 that divides p and is <= cap (or full p)."""
    if p % 128 != 0:
        return p
    t = max(cap - cap % 128, 128)
    while p % t != 0:
        t -= 128
    return t


def conv1x1_fused(x, w, b, *, apply_relu):
    """y = relu?(W @ x + b) per batch element, applied per point.

    x: (B, C_in, P)   activation dtype (f32 or bf16)
    w: (B_w, C_out, C_in), B_w in {1, B} (per-batch weight if B_w == B)
    b: (C_out,) float32
    returns (B, C_out, P) in x.dtype
    """
    B, c_in, P = x.shape
    bw, c_out, _ = w.shape
    tile = _choose_tile(P)
    n_tiles = P // tile
    b2d = b.reshape(c_out, 1).astype(jnp.float32)
    w_map = (lambda i, j: (i, 0, 0)) if bw > 1 else (lambda i, j: (0, 0, 0))

    flops = 2 * B * c_out * c_in * P
    bytes_accessed = ((B * c_in * P + B * c_out * P) * x.dtype.itemsize
                      + bw * c_out * c_in * w.dtype.itemsize + c_out * 4)
    kernel = functools.partial(_conv_bn_act_kernel, apply_relu=apply_relu)
    return pl.pallas_call(
        kernel,
        out_shape=jax.ShapeDtypeStruct((B, c_out, P), x.dtype),
        grid=(B, n_tiles),
        in_specs=[
            pl.BlockSpec((1, c_in, tile), lambda i, j: (i, 0, j)),
            pl.BlockSpec((1, c_out, c_in), w_map),
            pl.BlockSpec((c_out, 1), lambda i, j: (0, 0)),
        ],
        out_specs=pl.BlockSpec((1, c_out, tile), lambda i, j: (i, 0, j)),
        compiler_params=pltpu.CompilerParams(
            dimension_semantics=("parallel", "parallel"),
            vmem_limit_bytes=_VMEM_LIMIT),
        cost_estimate=pl.CostEstimate(flops=flops, transcendentals=0,
                                      bytes_accessed=bytes_accessed),
    )(x, w, b2d)


def conv1x1_bn_max(x, w, b, *, apply_relu):
    """max over points of relu?(W @ x + b); returns (B, C_out, 1) float32."""
    B, c_in, P = x.shape
    bw, c_out, _ = w.shape
    tile = _choose_tile(P)
    n_tiles = P // tile
    b2d = b.reshape(c_out, 1).astype(jnp.float32)
    w_map = (lambda i, j: (i, 0, 0)) if bw > 1 else (lambda i, j: (0, 0, 0))

    flops = 2 * B * c_out * c_in * P
    bytes_accessed = (B * c_in * P * x.dtype.itemsize
                      + bw * c_out * c_in * w.dtype.itemsize
                      + B * c_out * 4 + c_out * 4)
    kernel = functools.partial(_conv_bn_act_max_kernel, apply_relu=apply_relu)
    return pl.pallas_call(
        kernel,
        out_shape=jax.ShapeDtypeStruct((B, c_out, 1), jnp.float32),
        grid=(B, n_tiles),
        in_specs=[
            pl.BlockSpec((1, c_in, tile), lambda i, j: (i, 0, j)),
            pl.BlockSpec((1, c_out, c_in), w_map),
            pl.BlockSpec((c_out, 1), lambda i, j: (0, 0)),
        ],
        out_specs=pl.BlockSpec((1, c_out, 1), lambda i, j: (i, 0, 0)),
        compiler_params=pltpu.CompilerParams(
            dimension_semantics=("parallel", "arbitrary"),
            vmem_limit_bytes=_VMEM_LIMIT),
        cost_estimate=pl.CostEstimate(flops=flops, transcendentals=0,
                                      bytes_accessed=bytes_accessed),
    )(x, w, b2d)


def linear_fused(x, wt, b, *, apply_relu):
    """y = relu?(x @ Wt + b).  x: (B, C_in), Wt: (C_in, C_out), b: (C_out,)."""
    B, c_in = x.shape
    _, c_out = wt.shape
    b2d = b.reshape(1, c_out).astype(jnp.float32)
    kernel = functools.partial(_linear_act_kernel, apply_relu=apply_relu)
    return pl.pallas_call(
        kernel,
        out_shape=jax.ShapeDtypeStruct((B, c_out), jnp.float32),
        grid=(1,),
        in_specs=[
            pl.BlockSpec((B, c_in), lambda i: (0, 0)),
            pl.BlockSpec((c_in, c_out), lambda i: (0, 0)),
            pl.BlockSpec((1, c_out), lambda i: (0, 0)),
        ],
        out_specs=pl.BlockSpec((B, c_out), lambda i: (0, 0)),
        compiler_params=pltpu.CompilerParams(
            dimension_semantics=("arbitrary",),
            vmem_limit_bytes=_VMEM_LIMIT),
    )(x.astype(jnp.float32), wt.astype(jnp.float32), b2d)


# ----------------------------------------------------------------------------
# Parameter init (deterministic, PyTorch-default-style) and BN folding
# ----------------------------------------------------------------------------
def _init_conv(key, c_out, c_in):
    k1, k2 = jax.random.split(key)
    bound = 1.0 / (c_in ** 0.5)
    w = jax.random.uniform(k1, (c_out, c_in), jnp.float32, -bound, bound)
    b = jax.random.uniform(k2, (c_out,), jnp.float32, -bound, bound)
    return w, b


def _init_bn(key, c):
    k1, k2, k3, k4 = jax.random.split(key, 4)
    gamma = jax.random.uniform(k1, (c,), jnp.float32, 0.8, 1.2)
    beta = jax.random.uniform(k2, (c,), jnp.float32, -0.1, 0.1)
    mean = jax.random.uniform(k3, (c,), jnp.float32, -0.1, 0.1)
    var = jax.random.uniform(k4, (c,), jnp.float32, 0.5, 1.5)
    return gamma, beta, mean, var


def init_pointnetfeat_params(key):
    ks = jax.random.split(key, 20)
    stn = {
        'conv1': _init_conv(ks[0], 64, 3), 'bn1': _init_bn(ks[1], 64),
        'conv2': _init_conv(ks[2], 128, 64), 'bn2': _init_bn(ks[3], 128),
        'conv3': _init_conv(ks[4], 1024, 128), 'bn3': _init_bn(ks[5], 1024),
        'fc1': _init_conv(ks[6], 512, 1024), 'bn4': _init_bn(ks[7], 512),
        'fc2': _init_conv(ks[8], 256, 512), 'bn5': _init_bn(ks[9], 256),
        'fc3': _init_conv(ks[10], 9, 256),
    }
    return {
        'stn': stn,
        'conv1': _init_conv(ks[11], 64, 3), 'bn1': _init_bn(ks[12], 64),
        'conv2': _init_conv(ks[13], 128, 64), 'bn2': _init_bn(ks[14], 128),
        'conv3': _init_conv(ks[15], 1024, 128), 'bn3': _init_bn(ks[16], 1024),
    }


def _fold_bn(w, b, bn, eps=_BN_EPS):
    """Fold inference-mode BatchNorm into the preceding conv/linear weights."""
    gamma, beta, mean, var = bn
    scale = gamma / jnp.sqrt(var + eps)
    return w * scale[:, None], scale * (b - mean) + beta


# ----------------------------------------------------------------------------
# Forward passes
# ----------------------------------------------------------------------------
# TODO(synk): BatchNorm is implemented in inference mode (running statistics);
# training-mode per-batch statistics are not computed in-kernel.
def stn3d_forward(x, sp, compute_dtype=jnp.float32):
    B = x.shape[0]
    w1, b1 = _fold_bn(*sp['conv1'], sp['bn1'])
    w2, b2 = _fold_bn(*sp['conv2'], sp['bn2'])
    w3, b3 = _fold_bn(*sp['conv3'], sp['bn3'])

    xc = x.astype(compute_dtype)
    h = conv1x1_fused(xc, w1[None].astype(compute_dtype), b1, apply_relu=True)
    h = conv1x1_fused(h, w2[None].astype(compute_dtype), b2, apply_relu=True)
    g = conv1x1_bn_max(h, w3[None].astype(compute_dtype), b3, apply_relu=True)
    g = g.reshape(B, 1024)

    fw1, fb1 = _fold_bn(*sp['fc1'], sp['bn4'])
    fw2, fb2 = _fold_bn(*sp['fc2'], sp['bn5'])
    fw3, fb3 = sp['fc3']
    h = linear_fused(g, fw1.T, fb1, apply_relu=True)
    h = linear_fused(h, fw2.T, fb2, apply_relu=True)
    # Identity offset of the 3x3 transform folded into fc3's bias.
    iden = jnp.eye(3, dtype=jnp.float32).reshape(9)
    t = linear_fused(h, fw3.T, fb3 + iden, apply_relu=False)  # (B, 9)
    return t.reshape(B, 3, 3)


def pointnetfeat_forward(x, params, *, compute_dtype=jnp.float32):
    """x: (B, 3, N) -> (global_feat (B, 1024), trans (B, 3, 3), None)."""
    # TODO(synk): feature_transform=True (STNkd) and the global_feat=False
    # concat path are not implemented; defaults of the module only.
    B = x.shape[0]
    trans = stn3d_forward(x, params['stn'], compute_dtype)

    w1, b1 = _fold_bn(*params['conv1'], params['bn1'])
    w2, b2 = _fold_bn(*params['conv2'], params['bn2'])
    w3, b3 = _fold_bn(*params['conv3'], params['bn3'])
    # Fold the learned 3x3 input transform into conv1's (per-batch) weight:
    #   conv1(trans^T @ x) == (W1 @ trans^T) @ x   (1x1 conv is linear).
    w1b = jnp.einsum('oc,bdc->bod', w1, trans, precision='highest')  # (B,64,3)

    xc = x.astype(compute_dtype)
    h = conv1x1_fused(xc, w1b.astype(compute_dtype), b1, apply_relu=True)
    h = conv1x1_fused(h, w2[None].astype(compute_dtype), b2, apply_relu=True)
    g = conv1x1_bn_max(h, w3[None].astype(compute_dtype), b3, apply_relu=False)
    return g.reshape(B, 1024), trans, None


# ----------------------------------------------------------------------------
# Plain-JAX reference (mirrors the PyTorch forward, BN in eval mode)
# ----------------------------------------------------------------------------
def _ref_bn(x, bn, eps=_BN_EPS):
    gamma, beta, mean, var = bn
    shp = (1, -1, 1) if x.ndim == 3 else (1, -1)
    return (gamma.reshape(shp) * (x - mean.reshape(shp))
            / jnp.sqrt(var.reshape(shp) + eps) + beta.reshape(shp))


def _ref_conv(x, wb):
    w, b = wb
    return jnp.einsum('oc,bcn->bon', w, x, precision='highest') + b[None, :, None]


def _ref_linear(x, wb):
    w, b = wb
    return jnp.einsum('oc,bc->bo', w, x, precision='highest') + b[None, :]


def _ref_stn3d(x, sp):
    B = x.shape[0]
    h = jax.nn.relu(_ref_bn(_ref_conv(x, sp['conv1']), sp['bn1']))
    h = jax.nn.relu(_ref_bn(_ref_conv(h, sp['conv2']), sp['bn2']))
    h = jax.nn.relu(_ref_bn(_ref_conv(h, sp['conv3']), sp['bn3']))
    h = jnp.max(h, axis=2)
    h = jax.nn.relu(_ref_bn(_ref_linear(h, sp['fc1']), sp['bn4']))
    h = jax.nn.relu(_ref_bn(_ref_linear(h, sp['fc2']), sp['bn5']))
    h = _ref_linear(h, sp['fc3']) + jnp.eye(3, dtype=jnp.float32).reshape(1, 9)
    return h.reshape(B, 3, 3)


def _ref_pointnetfeat(x, params):
    trans = _ref_stn3d(x, params['stn'])
    xt = jnp.einsum('bcn,bcd->bdn', x, trans, precision='highest')
    h = jax.nn.relu(_ref_bn(_ref_conv(xt, params['conv1']), params['bn1']))
    h = jax.nn.relu(_ref_bn(_ref_conv(h, params['conv2']), params['bn2']))
    h = _ref_bn(_ref_conv(h, params['conv3']), params['bn3'])
    return jnp.max(h, axis=2), trans


# ----------------------------------------------------------------------------
if __name__ == "__main__":
    B, N_PTS = 2, 256  # small: batch=2, 256 points (channels fixed by module)

    key = jax.random.PRNGKey(0)
    kx, kp = jax.random.split(key)
    x = jax.random.normal(kx, (B, 3, N_PTS), dtype=jnp.float32)
    params = init_pointnetfeat_params(kp)

    # Float32 run + correctness check against the plain-JAX reference.
    g, trans, trans_feat = pointnetfeat_forward(x, params,
                                                compute_dtype=jnp.float32)
    g = jax.block_until_ready(g)
    g_ref, trans_ref = _ref_pointnetfeat(x, params)

    assert g.shape == (B, 1024) and trans.shape == (B, 3, 3)
    assert trans_feat is None
    assert jnp.allclose(trans, trans_ref, atol=1e-2, rtol=1e-2), "trans mismatch"
    assert jnp.allclose(g, g_ref, atol=1e-2, rtol=1e-2), "global feature mismatch"

    # bf16 run (memory-bound conv stack in bf16, f32 accumulation): sanity only.
    g16, trans16, _ = pointnetfeat_forward(x, params,
                                           compute_dtype=jnp.bfloat16)
    g16 = jax.block_until_ready(g16)
    assert g16.shape == (B, 1024) and bool(jnp.isfinite(g16).all())
    assert trans16.shape == (B, 3, 3)

    print("KERNEL_OK")
</pallas_src>

<mosaic_0001>
module attributes {stable_mosaic.version = 11 : i64} {
  func.func @_conv_bn_act_kernel(%arg0: i32, %arg1: i32, %arg2: memref<1x3x256xf32, #tpu.memory_space<vmem>>, %arg3: memref<1x64x3xf32, #tpu.memory_space<vmem>>, %arg4: memref<64x1xf32, #tpu.memory_space<vmem>>, %arg5: memref<1x64x256xf32, #tpu.memory_space<vmem>>) attributes {dimension_semantics = [#tpu.dimension_semantics<parallel>, #tpu.dimension_semantics<parallel>], iteration_bounds = array<i64: 2, 1>, scalar_prefetch = 0 : i64, scratch_operands = 0 : i64, tpu.core_type = #tpu.core_type<tc>, window_params = [{transform_indices = @transform_0, window_bounds = array<i64: 1, 3, 256>}, {pipeline_mode = #tpu.pipeline_mode<synchronous>, transform_indices = @transform_1, window_bounds = array<i64: 1, 64, 3>}, {pipeline_mode = #tpu.pipeline_mode<synchronous>, transform_indices = @transform_2, window_bounds = array<i64: 64, 1>}, {transform_indices = @transform_3, window_bounds = array<i64: 1, 64, 256>}]} {
    %c0 = arith.constant 0 : index
    %c0_0 = arith.constant 0 : index
    %c0_1 = arith.constant 0 : index
    %0 = vector.load %arg2[%c0, %c0_0, %c0_1] : memref<1x3x256xf32, #tpu.memory_space<vmem>>, vector<1x3x256xf32>
    %1 = vector.shape_cast %0 : vector<1x3x256xf32> to vector<3x256xf32>
    %c0_2 = arith.constant 0 : index
    %c0_3 = arith.constant 0 : index
    %c0_4 = arith.constant 0 : index
    %2 = vector.load %arg3[%c0_2, %c0_3, %c0_4] : memref<1x64x3xf32, #tpu.memory_space<vmem>>, vector<1x64x3xf32>
    %3 = vector.shape_cast %2 : vector<1x64x3xf32> to vector<64x3xf32>
    %cst = arith.constant dense<0.000000e+00> : vector<64x256xf32>
    %4 = tpu.matmul %3, %1, %cst {dimension_numbers = #tpu.dot_dimension_numbers<[1], [0], [0], [1], [0, 0, 1, 1], [], []>} : vector<64x3xf32>, vector<3x256xf32>, vector<64x256xf32> -> vector<64x256xf32>
    %c0_5 = arith.constant 0 : index
    %c0_6 = arith.constant 0 : index
    %5 = vector.load %arg4[%c0_5, %c0_6] : memref<64x1xf32, #tpu.memory_space<vmem>>, vector<64x1xf32>
    %6 = vector.broadcast %5 : vector<64x1xf32> to vector<64x256xf32>
    %7 = arith.addf %4, %6 : vector<64x256xf32>
    %cst_7 = arith.constant 0.000000e+00 : f32
    %8 = vector.broadcast %cst_7 : f32 to vector<64x256xf32>
    %9 = arith.maximumf %7, %8 : vector<64x256xf32>
    %c0_8 = arith.constant 0 : index
    %c0_9 = arith.constant 0 : index
    %c0_10 = arith.constant 0 : index
    %10 = vector.load %arg5[%c0_8, %c0_9, %c0_10] : memref<1x64x256xf32, #tpu.memory_space<vmem>>, vector<1x64x256xf32>
    %11 = vector.shape_cast %10 : vector<1x64x256xf32> to vector<64x256xf32>
    %12 = vector.shape_cast %9 : vector<64x256xf32> to vector<1x64x256xf32>
    tpu.vector_store %arg5[%c0_8, %c0_9, %c0_10], %12 {strides = array<i32>} : memref<1x64x256xf32, #tpu.memory_space<vmem>>, vector<1x64x256xf32>,
    return
  }
  func.func @transform_0(%arg0: i32, %arg1: i32) -> (i32, i32, i32) {
    %c0_i32 = arith.constant 0 : i32
    %c0_i32_0 = arith.constant 0 : i32
    return %arg0, %c0_i32, %arg1 : i32, i32, i32
  }
  func.func @transform_1(%arg0: i32, %arg1: i32) -> (i32, i32, i32) {
    %c0_i32 = arith.constant 0 : i32
    %c0_i32_0 = arith.constant 0 : i32
    %c0_i32_1 = arith.constant 0 : i32
    %c0_i32_2 = arith.constant 0 : i32
    return %c0_i32, %c0_i32_0, %c0_i32_1 : i32, i32, i32
  }
  func.func @transform_2(%arg0: i32, %arg1: i32) -> (i32, i32) {
    %c0_i32 = arith.constant 0 : i32
    %c0_i32_0 = arith.constant 0 : i32
    %c0_i32_1 = arith.constant 0 : i32
    return %c0_i32, %c0_i32_0 : i32, i32
  }
  func.func @transform_3(%arg0: i32, %arg1: i32) -> (i32, i32, i32) {
    %c0_i32 = arith.constant 0 : i32
    %c0_i32_0 = arith.constant 0 : i32
    return %arg0, %c0_i32, %arg1 : i32, i32, i32
  }
}

</mosaic_0001>

<bundles_post_ra>
// kernel: tpu_custom_call.1
= control target key start
LH: loop header
LB: loop body
LE: loop exit
PB: predicated region body
PF: predicated region fallthrough
CT: control target
= control target key end

     0   :  { %8 = vsyncpa [#allocation3], 0  ;;  %s921_s0 = inlined_call_operand.vmem [shape: f32[2,3,256], index: 0, kind: input, shape index: {}]   ;;  %s922_s1 = inlined_call_operand.vmem [shape: f32[1,64,3], index: 1, kind: input, shape index: {}]   ;;  %s923_s2 = inlined_call_operand.vmem [shape: f32[64,1], index: 2, kind: input, shape index: {}]   ;;  %s924_s3 = inlined_call_operand.hbm [shape: f32[2,64,256], index: 3, kind: output, shape index: {}]  }
   0x1   :  { %10 = vsyncpa [#allocation3 + $0x1], 0  ;;  %s723_s12 = smov 0   ;;  %s725_s13 = smov 0  }
   0x2   :  { %s727_s14 = smov 0   ;;  %s729_s15 = smov 0  }
   0x3   :  { %s731_s16 = smov 0   ;;  %s733_s17 = smov 0  }
   0x4 LB: > { %s529_s18 = sadd.s32 4294967295, %s696_s17   ;;  %s530_s19 = sadd.s32 4294967294, %s696_s17   ;;  %s696_s17 = sphi %s733_s17, %s16_s17   ;;  %s692_s16 = sphi %s731_s16, %s931_s16   ;;  %s688_s15 = sphi %s729_s15, %s930_s15   ;;  %s684_s14 = sphi %s727_s14, %s929_s14   ;;  %s680_s13 = sphi %s725_s13, %s928_s13   ;;  %s676_s12 = sphi %s723_s12, %s927_s12  }
   0x5   : > { %s28_s20 = sadd.s32 1, %s692_s16  ;;  %s107_s21 = sadd.s32 1, %s684_s14 }
   0x6   : > { %p30_p0 = scmp.ge.s32.totalorder %s28_s20, 2  ;;  %p117_p1 = scmp.ne.s32.totalorder %s684_s14, %s680_s13 }
   0x7   : > { %p118_p2 = scmp.eq.s32.totalorder %s529_s18, 1  ;;  %p123_p3 = scmp.ne.s32.totalorder %s680_s13, %s676_s12 }
   0x8   : > { %s933_s20 = smov (%p30_p0, %s28_s20), 0  ;;  %p124_p5 = scmp.eq.s32.totalorder %s530_s19, 1 }
   0x9   : > { %p763_p4 = por %p118_p2, %p117_p1  ;;  %s102_s23 = ssub.s32 %s692_s16, %s933_s20 }
   0xa   : > { %p533_p6 = scmp.ge.s32.totalorder %s696_s17, 1  ;;  %p105_p7 = scmp.eq.s32.totalorder %s102_s23, 0 }
   0xb   : > { %p770_p8 = por %p124_p5, %p123_p3  ;;  %p161_p9 = scmp.lt.s32.totalorder %s696_s17, 3 }
   0xc   : > { %s776_s25 = scalar_select %p105_p7, %s684_s14, %s107_s21  }
   0xd   : > { %p162_p10 = pnand %p533_p6, %p161_p9 }
   0xe   : > { %p190_p11 = scmp.lt.s32.totalorder (!%p162_p10), %s688_s15, 1  ;;  %v698_v0 = vmov (!%p162_p10), 0.0   ;;  %v699_v1 = vmov (!%p162_p10), 0   ;;  %v211_v2 = vld [vmem:[%s923_s2 + $0x10] sm:$0xff] (!%p162_p10)  ;;  %v209_v3 = vld [vmem:[%s923_s2] sm:$0xff] (!%p162_p10)  ;;  %v212_v4 = vld [vmem:[%s923_s2 + $0x18] sm:$0xff] (!%p162_p10) }
   0xf   : > { %165 = sbr.rel (%p162_p10) target bundleno = 275 (0x113), region = 32  ;;  %353 = vmatprep.mubr.f32.mxu0 (!%p162_p10), %v698_v0  ;;  %377 = vmatprep.mubr.f32.mxu1 (!%p162_p10), %v698_v0  ;;  %v210_v5 = vld [vmem:[%s923_s2 + $0x8] sm:$0xff] (!%p162_p10)  ;;  %vm284_vm0 = vcmask (!%p162_p10), 1042432   ;;  %v201_v8 = vld [vmem:[%s922_s1] sm:$0xff] (!%p162_p10)  ;;  %vm259_vm1 = vcmask (!%p162_p10), 23552   ;;  %v216_v14 = vld [vmem:[%s923_s2 + $0x38] sm:$0xff] (!%p162_p10) }
  0x10   : > { %616 = vset.pattern.permute.xlu1 (!%p162_p10), %v699_v1  ;;  %615 = vset.pattern.permute.xlu0 (!%p162_p10), %v699_v1  ;;  %v205_v9 = vld [vmem:[%s922_s1 + $0x20] sm:$0xff] (!%p162_p10)  ;;  %v214_v10 = vld [vmem:[%s923_s2 + $0x28] sm:$0xff] (!%p162_p10)  ;;  %v215_v15 = vld [vmem:[%s923_s2 + $0x30] sm:$0xff] (!%p162_p10)  ;;  %s186_s29 = sand.u32 (!%p162_p10), 1, %s680_s13   ;;  %s553_s5 = sshll.u32 (!%p162_p10), %s688_s15, 11 }
  0x11   : > { %229 = vperm.xlu1 (!%p162_p10), %616, %v211_v2   ;;  %219 = vperm.xlu0 (!%p162_p10), %615, %v209_v3   ;;  %v213_v11 = vld [vmem:[%s923_s2 + $0x20] sm:$0xff] (!%p162_p10)  ;;  %v202_v12 = vld [vmem:[%s922_s1 + $0x8] sm:$0xff] (!%p162_p10)  ;;  %v203_v16 = vld [vmem:[%s922_s1 + $0x10] sm:$0xff] (!%p162_p10)  ;;  %s534_s30 = sshll.u32 (!%p162_p10), %s186_s29, 7  ;;  %s865_s8 = scalar_lea.hbm (!%p162_p10), %s924_s3, %s553_s5 }
  0x12   : > { %v206_v13 = vld [vmem:[%s922_s1 + $0x28] sm:$0xff] (!%p162_p10)  ;;  %v207_v17 = vld [vmem:[%s922_s1 + $0x30] sm:$0xff] (!%p162_p10)  ;;  %v204_v18 = vld [vmem:[%s922_s1 + $0x18] sm:$0xff] (!%p162_p10)  ;;  %s875_s9 = scalar_lea.sflag (!%p162_p10), [#allocation3], %s186_s29  ;;  %s700_s11 = smov (!%p162_p10), [#allocation2]  }
  0x13   : > { %v208_v19 = vld [vmem:[%s922_s1 + $0x38] sm:$0xff] (!%p162_p10)  ;;  %s622_s18 = sshll.u32 (!%p162_p10), %s700_s11, 4  ;;  %s623_s18 = int_to_ptr.vmem [resolvable:$false] %s622_s18 }
  0x14   : > { %s624_s19 = scalar_lea.vmem (!%p162_p10), %s623_s18, 4096 }
  0x15   : > { %234 = vperm.xlu1 (!%p162_p10), %616, %v212_v4   ;;  %224 = vperm.xlu0 (!%p162_p10), %615, %v210_v5  }
  0x16   : > { %s191_s26 = scalar_select %p190_p11, %s688_s15, 1 }
  0x18   : > { %s552_s4 = sshll.u32 %s191_s26, 3 }
  0x19   : > { %s197_s7 = scalar_lea.vmem %s921_s0, %s552_s4  ;;  %244 = vperm.xlu1 %616, %v214_v10   ;;  %239 = vperm.xlu0 %615, %v213_v11   ;;  %s844_s4 = scalar_lea.vmem [#allocation2], %s534_s30 }
  0x1a   : > { %v200_v6 = vld [vmem:[%s197_s7] sm:$0x77]  ;;  %s450_s6 = sshll.u32 %s844_s4, 4  ;;  %s867_s6 = int_to_ptr.vmem [resolvable:$true] %s450_s6 }
  0x1b   : > { %v258_v7 = vcombine.high %v200_v6, %v200_v6  ;;  %s618_s10 = scalar_lea.vmem %s867_s6, 2048  ;;  %p625_p1 = scmp.lt.s32.totalorder %s867_s6, %s623_s18 }
  0x1c   : > { %p619_p12 = scmp.ne.s32.totalorder %s867_s6, %s618_s10  ;;  %p626_p2 = scmp.lt.s32.totalorder %s624_s19, %s618_s10 }
  0x1d   : > { %537 = vmatprep.subr.msk.mxu0 %vm284_vm0, %v258_v7  ;;  %554 = vmatprep.subr.msk.mxu1 %vm284_vm0, %v258_v7 }
  0x1e   : > { %538 = vmatpush1.msk.msra.mxu0 %vm284_vm0, %v200_v6  ;;  %555 = vmatpush1.msk.msra.mxu1 %vm284_vm0, %v200_v6  ;;  %p620_p13 = pnand %p619_p12, %p763_p4  ;;  %p627_p3 = por %p626_p2, %p625_p1 }
  0x1f   : > { %539 = vmatmul.mubr.msk.f32.vlgmr.msra.gmra.mrb[0].mxu0 %vm259_vm1, %v201_v8  ;;  %543 = vmatmul.mubr.msk.f32.vlgmr.msra.gmra.mrb[0].mxu1 %vm259_vm1, %v205_v9 }
  0x20   : > { %359 = vmatprep.mubr.f32.mxu0 %v698_v0  ;;  %383 = vmatprep.mubr.f32.mxu1 %v698_v0  ;;  %p621_p0 = pneg %p620_p13 }
  0x21   : > { %254 = vperm.xlu1 %616, %v216_v14   ;;  %249 = vperm.xlu0 %615, %v215_v15  }
  0x22   : > { %p628_p5 = pnand %p627_p3, %p621_p0 }
  0x23   : > { %540 = vmatmul.mubr.msk.f32.gmra.mrb[2].mxu0 %vm259_vm1, %v202_v12  ;;  %544 = vmatmul.mubr.msk.f32.gmra.mrb[2].mxu1 %vm259_vm1, %v206_v13 }
  0x24   : > { %365 = vmatprep.mubr.f32.mxu0 %v698_v0  ;;  %389 = vmatprep.mubr.f32.mxu1 %v698_v0 }
  0x27   : > { %541 = vmatmul.mubr.msk.f32.gmra.mrb[4].mxu0 %vm259_vm1, %v203_v16  ;;  %545 = vmatmul.mubr.msk.f32.gmra.mrb[4].mxu1 %vm259_vm1, %v207_v17 }
  0x28   : > { %371 = vmatprep.mubr.f32.mxu0 %v698_v0  ;;  %395 = vmatprep.mubr.f32.mxu1 %v698_v0 }
  0x2b   : > { %542 = vmatmul.mubr.msk.f32.gmra.mrb[6].mxu0 %vm259_vm1, %v204_v18  ;;  %546 = vmatmul.mubr.msk.f32.gmra.mrb[6].mxu1 %vm259_vm1, %v208_v19 }
  0x90   : > { %v220_v20 = vpop.permute.xlu0 %219  ;;  %v230_v21 = vpop.permute.xlu1 %229 }
  0x94   : > { %v225_v22 = vpop.permute.xlu0 %224  ;;  %v840_v23 = vpop.permute.xlu1 %234 }
  0x98   : > { %v240_v24 = vpop.permute.xlu0 %239  ;;  %v245_v33 = vpop.permute.xlu1 %244 }
  0xa0   : > { %v250_v46 = vpop.permute.xlu0 %249  ;;  %v255_v59 = vpop.permute.xlu1 %254 }
  0xf2   : > { %v355_v25 = vpop.f32.mrb[0].mxu0  ;;  %v379_v26 = vpop.f32.mrb[0].mxu1 }
  0xf3   : > { %v356_v27 = vadd.f32 %v355_v25, %v220_v20  ;;  %v380_v28 = vadd.f32 %v379_v26, %v240_v24  ;;  %v357_v29 = vpop.f32.mrb[1].mxu0  ;;  %v381_v30 = vpop.f32.mrb[1].mxu1 }
  0xf4   : > { %v358_v31 = vadd.f32 %v357_v29, %v220_v20  ;;  %v382_v32 = vadd.f32 %v381_v30, %v240_v24 }
  0xf5   : > { %v402_v34 = vmax.f32 %v356_v27, 0.0  ;;  %v410_v35 = vmax.f32 %v380_v28, 0.0 }
  0xf6   : > { %v403_v36 = vmax.f32 %v358_v31, 0.0  ;;  %v411_v37 = vmax.f32 %v382_v32, 0.0  ;;  %v361_v38 = vpop.f32.mrb[2].mxu0  ;;  %v385_v39 = vpop.f32.mrb[2].mxu1 }
  0xf7   : > { %418 = vst [vmem:[%s844_s4] sm:$0xff] %v402_v34  ;;  %426 = vst [vmem:[%s844_s4 + $0x40] sm:$0xff] %v410_v35  ;;  %v362_v40 = vadd.f32 %v361_v38, %v225_v22  ;;  %v386_v41 = vadd.f32 %v385_v39, %v245_v33  ;;  %v363_v42 = vpop.f32.mrb[3].mxu0  ;;  %v387_v43 = vpop.f32.mrb[3].mxu1 }
  0xf8   : > { %419 = vst [vmem:[%s844_s4 + $0x8] sm:$0xff] %v403_v36  ;;  %427 = vst [vmem:[%s844_s4 + $0x48] sm:$0xff] %v411_v37  ;;  %v364_v44 = vadd.f32 %v363_v42, %v225_v22  ;;  %v388_v45 = vadd.f32 %v387_v43, %v245_v33 }
  0xf9   : > { %v404_v47 = vmax.f32 %v362_v40, 0.0  ;;  %v412_v48 = vmax.f32 %v386_v41, 0.0 }
  0xfa   : > { %v405_v49 = vmax.f32 %v364_v44, 0.0  ;;  %v413_v50 = vmax.f32 %v388_v45, 0.0  ;;  %v367_v51 = vpop.f32.mrb[4].mxu0  ;;  %v391_v52 = vpop.f32.mrb[4].mxu1 }
  0xfb   : > { %420 = vst [vmem:[%s844_s4 + $0x10] sm:$0xff] %v404_v47  ;;  %428 = vst [vmem:[%s844_s4 + $0x50] sm:$0xff] %v412_v48  ;;  %v368_v53 = vadd.f32 %v367_v51, %v230_v21  ;;  %v392_v54 = vadd.f32 %v391_v52, %v250_v46  ;;  %v369_v55 = vpop.f32.mrb[5].mxu0  ;;  %v393_v56 = vpop.f32.mrb[5].mxu1 }
  0xfc   : > { %421 = vst [vmem:[%s844_s4 + $0x18] sm:$0xff] %v405_v49  ;;  %429 = vst [vmem:[%s844_s4 + $0x58] sm:$0xff] %v413_v50  ;;  %v370_v57 = vadd.f32 %v369_v55, %v230_v21  ;;  %v394_v58 = vadd.f32 %v393_v56, %v250_v46 }
  0xfd   : > { %v406_v60 = vmax.f32 %v368_v53, 0.0  ;;  %v414_v61 = vmax.f32 %v392_v54, 0.0 }
  0xfe   : > { %v407_v62 = vmax.f32 %v370_v57, 0.0  ;;  %v415_v63 = vmax.f32 %v394_v58, 0.0  ;;  %v373_v0 = vpop.f32.mrb[6].mxu0  ;;  %v397_v1 = vpop.f32.mrb[6].mxu1 }
  0xff   : > { %422 = vst [vmem:[%s844_s4 + $0x20] sm:$0xff] %v406_v60  ;;  %430 = vst [vmem:[%s844_s4 + $0x60] sm:$0xff] %v414_v61  ;;  %v374_v2 = vadd.f32 %v373_v0, %v840_v23  ;;  %v398_v3 = vadd.f32 %v397_v1, %v255_v59  ;;  %v375_v4 = vpop.f32.mrb[7].mxu0  ;;  %v399_v5 = vpop.f32.mrb[7].mxu1 }
 0x100   : > { %423 = vst [vmem:[%s844_s4 + $0x28] sm:$0xff] %v407_v62  ;;  %431 = vst [vmem:[%s844_s4 + $0x68] sm:$0xff] %v415_v63  ;;  %v376_v6 = vadd.f32 %v375_v4, %v840_v23  ;;  %v400_v7 = vadd.f32 %v399_v5, %v255_v59 }
 0x101   : > { %v408_v8 = vmax.f32 %v374_v2, 0.0  ;;  %v416_v9 = vmax.f32 %v398_v3, 0.0 }
 0x102   : > { %v409_v10 = vmax.f32 %v376_v6, 0.0  ;;  %v417_v11 = vmax.f32 %v400_v7, 0.0 }
 0x103   : > { %424 = vst [vmem:[%s844_s4 + $0x30] sm:$0xff] %v408_v8  ;;  %432 = vst [vmem:[%s844_s4 + $0x70] sm:$0xff] %v416_v9 }
 0x104   : > { %425 = vst [vmem:[%s844_s4 + $0x38] sm:$0xff] %v409_v10  ;;  %433 = vst [vmem:[%s844_s4 + $0x78] sm:$0xff] %v417_v11 }
 0x105   : > { %631 = shalt.err (!%p628_p5)
}
 0x106   : > { %s632_s21 = scalar_lea.hbm %s865_s8, 2048  ;;  %s636_s27 = scalar_lea.hbm %s924_s3, 4096 }
 0x107   : > { %p633_p6 = scmp.ne.s32.totalorder %s865_s8, %s632_s21  ;;  %p637_p10 = scmp.lt.u32.totalorder %s865_s8, %s924_s3 }
 0x108   : > { %p638_p11 = scmp.lt.u32.totalorder %s636_s27, %s632_s21  ;;  %p640_p13 = scmp.lt.u32.totalorder %s632_s21, %s865_s8 }
 0x109   : > { %p634_p7 = pnand %p633_p6, %p763_p4 }
 0x10a   : > { %p639_p12 = por %p638_p11, %p637_p10 }
 0x10b   : > { %p635_p9 = pneg %p634_p7 }
 0x10c   : > { %p641_p0 = por %p640_p13, %p639_p12 }
 0x10e   : > { %p642_p1 = pnand %p641_p0, %p635_p9 }
 0x110   : > { %645 = shalt.err (!%p642_p1)
}
 0x111   : > { %s701_s30 = smov 256   ;;  %s702_s4 = smov 16  }
 0x112   : > { %556 = dma.vmem_to_hbm [thread:$0]  (%p763_p4), %s867_s6, 2048, %s865_s8, %s875_s9, %s701_s30, %s701_s30, %s702_s4  }
 0x113 PF: > { %p562_p2 = scmp.ge.s32.totalorder %s696_s17, 2  ;;  %s465_s5 = sand.u32 1, %s676_s12  }
 0x114   : > { %s466_s15 = scalar_lea.sflag [#allocation3], %s465_s5 }
 0x115   : > { %p559_p3 = pnand %p562_p2, %p770_p8 }
 0x117   : > { %671 = dma.done.wait (!%p559_p3), %s466_s15, 2048  }
 0x118   : > { %673 = vsyncadd (!%p559_p3), %s466_s15, 4294965248  ;;  %s16_s17 = sadd.s32 1, %s696_s17   ;;  %s927_s12 = smov %s680_s13 }
 0x119   : > { %p13_p5 = scmp.ge.s32.totalorder %s16_s17, 4   ;;  %s928_s13 = smov %s684_s14 }
 0x11a   : > { %s929_s14 = smov %s776_s25  ;;  %s930_s15 = smov %s692_s16 }
 0x11b   : > { %s931_s16 = smov %s933_s20  ;;  %15 = sbr.rel (!%p13_p5) target bundleno = 4 (0x4), region = 67 }
 0x122   :  { %471 = vsyncpa [#allocation3], 1 }
 0x123   :  { %473 = vsyncpa [#allocation3 + $0x1], 1 }

</bundles_post_ra>
